<compile_context>
chip_gen: v6e
topology: v6e:2x2x1
jax: 0.10.0
libtpu: 0.0.40
codegen_flags: <defaults>
</compile_context>

<pallas_src>
import functools

import jax
import jax.numpy as jnp
from jax.experimental import pallas as pl
from jax.experimental.pallas import tpu as pltpu


def _round_up(n: int, m: int) -> int:
    return ((n + m - 1) // m) * m


def _ensemble_fused_kernel(x_ref, w1_ref, w2_ref, bias_ref, o_ref, *, mhp):
    # x_ref   : (B, D)         shared input
    # w1_ref  : (D, MHp)       all models' layer-1 weights, pre-transposed & fused
    # w2_ref  : (MHp, MCp)     block-diagonal layer-2 weights (pre-transposed)
    # bias_ref: (1, MHp + MCp) packed [b1_fused | b2_fused] (zeros in padded tails)
    # o_ref   : (B, MCp)       lane-dense fused logits
    b1 = bias_ref[:, :mhp]            # (1, MHp)  static, 128-lane aligned slice
    b2 = bias_ref[:, mhp:]            # (1, MCp)
    h = jnp.dot(x_ref[...], w1_ref[...], preferred_element_type=jnp.float32)
    h = jnp.maximum(h + b1, 0.0)                                  # ReLU
    y = jnp.dot(h, w2_ref[...], preferred_element_type=jnp.float32)
    o_ref[...] = (y + b2).astype(o_ref.dtype)


def prepare_ensemble_params(w1, b1, w2, b2):
    """One-time (stack-time) re-layout of the stacked per-model parameters.

    w1: (M, H, D), b1: (M, 1, H), w2: (M, C, H), b2: (M, 1, C)
    Returns (fused_arrays_dict, static_dims_dict).
    """
    M, H, D = w1.shape
    C = w2.shape[1]
    MH, MC = M * H, M * C
    # Fused lane widths: hidden dim multiple of 256 (v6e/v7x MXU tile, also /128
    # for v5e); output dim multiple of 128 (unmasked lane-dense stores).
    MHp = _round_up(MH, 256)
    MCp = _round_up(MC, 128)

    # Layer 1: (M, H, D) -> (D, M*H), zero-padded to (D, MHp).
    w1_fused = jnp.transpose(w1, (2, 0, 1)).reshape(D, MH)
    w1_fused = jnp.pad(w1_fused, ((0, 0), (0, MHp - MH)))
    b1_fused = jnp.pad(b1.reshape(1, MH), ((0, 0), (0, MHp - MH)))

    # Layer 2: block-diagonal (M*H, M*C) so it is one lane-dense matmul.
    # NOTE: O(M^2) memory — fine at M=15 (~256 KB); for large ensembles switch
    # to a grid over model groups with compact (H, C) per-group weights.
    w2_t = jnp.transpose(w2, (0, 2, 1))                           # (M, H, C)
    eye = jnp.eye(M, dtype=w2.dtype)
    w2_bd = jnp.einsum('mn,mhc->mhnc', eye, w2_t).reshape(MH, MC)
    w2_bd = jnp.pad(w2_bd, ((0, MHp - MH), (0, MCp - MC)))
    b2_fused = jnp.pad(b2.reshape(1, MC), ((0, 0), (0, MCp - MC)))

    # Pack both biases into a single auxiliary input (fewer DMA descriptors).
    bias_packed = jnp.concatenate([b1_fused, b2_fused], axis=1)   # (1, MHp+MCp)

    fused = dict(w1=w1_fused, w2=w2_bd, bias=bias_packed)
    dims = dict(M=M, H=H, D=D, C=C, MH=MH, MC=MC, MHp=MHp, MCp=MCp)
    return fused, dims


def _call_kernel(x, w1_fused, w2_bd, bias_packed, dims):
    """Single fused, grid-less kernel invocation (everything VMEM-resident)."""
    B = x.shape[0]
    D, MHp, MCp = dims['D'], dims['MHp'], dims['MCp']
    flops = 2 * B * D * MHp + 2 * B * MHp * MCp
    bytes_accessed = 4 * (x.size + w1_fused.size + w2_bd.size
                          + bias_packed.size + B * MCp)
    kernel = functools.partial(_ensemble_fused_kernel, mhp=MHp)
    vmem = pl.BlockSpec(memory_space=pltpu.MemorySpace.VMEM)
    return pl.pallas_call(
        kernel,
        out_shape=jax.ShapeDtypeStruct((B, MCp), jnp.float32),
        in_specs=[vmem, vmem, vmem, vmem],
        out_specs=vmem,
        cost_estimate=pl.CostEstimate(
            flops=flops, transcendentals=0, bytes_accessed=bytes_accessed),
    )(x, w1_fused, w2_bd, bias_packed)


def make_ensemble(w1, b1, w2, b2):
    """Builds jitted forward / predict_proba / predict_entropy with the weight
    re-layout hoisted out of the per-call hot path (done once here)."""
    fused, dims = prepare_ensemble_params(w1, b1, w2, b2)
    M, C, MC = dims['M'], dims['C'], dims['MC']

    @jax.jit
    def forward(x):
        # Kernel + one tiny fused consumer recovering the torch vmap layout.
        y_pad = _call_kernel(x, fused['w1'], fused['w2'], fused['bias'], dims)
        y = y_pad[:, :MC].reshape(x.shape[0], M, C)
        return jnp.transpose(y, (1, 0, 2))                        # (M, B, C)

    @jax.jit
    def predict_proba(x):
        # Consumes the padded kernel output directly: un-pad + softmax + mean
        # fuse into one XLA consumer (no (M,B,C) intermediate materialized).
        y_pad = _call_kernel(x, fused['w1'], fused['w2'], fused['bias'], dims)
        logits = y_pad[:, :MC].reshape(x.shape[0], M, C)          # (B, M, C)
        return jax.nn.softmax(logits, axis=-1).mean(axis=1)       # (B, C)

    @jax.jit
    def predict_entropy(x):
        p = predict_proba(x).max(axis=1)                          # (B,)
        term = lambda q: jnp.nan_to_num(q * jnp.log(q))
        return -(term(p) + term(1.0 - p))

    return forward, predict_proba, predict_entropy


def ensemble_forward(x, w1, b1, w2, b2):
    """Convenience one-shot path (prep + forward). Prefer make_ensemble()."""
    fused, dims = prepare_ensemble_params(w1, b1, w2, b2)
    y_pad = _call_kernel(x, fused['w1'], fused['w2'], fused['bias'], dims)
    y = y_pad[:, :dims['MC']].reshape(x.shape[0], dims['M'], dims['C'])
    return jnp.transpose(y, (1, 0, 2))


def ensemble_forward_ref(x, w1, b1, w2, b2):
    """Plain-JAX reference (mirrors torch.func.vmap over stacked params)."""
    def one(w1m, b1m, w2m, b2m):
        h = jnp.maximum(x @ w1m.T + b1m[0], 0.0)
        return h @ w2m.T + b2m[0]
    return jax.vmap(one)(w1, b1, w2, b2)


if __name__ == "__main__":
    # Small deterministic shapes consistent with the module (default num_models=15).
    num_models = 15
    batch = 8
    in_features = 32
    hidden = 32
    num_classes = 8

    key = jax.random.PRNGKey(0)
    kx, k1, k2, k3, k4 = jax.random.split(key, 5)

    x = jax.random.normal(kx, (batch, in_features), dtype=jnp.float32)
    # Deterministic "stack_module_state"-style stacked parameters.
    w1 = jax.random.normal(k1, (num_models, hidden, in_features), jnp.float32) * 0.1
    b1 = jax.random.normal(k2, (num_models, 1, hidden), jnp.float32) * 0.1
    w2 = jax.random.normal(k3, (num_models, num_classes, hidden), jnp.float32) * 0.1
    b2 = jax.random.normal(k4, (num_models, 1, num_classes), jnp.float32) * 0.1

    # One-time prep (stack time); the jitted hot paths contain only the kernel
    # plus a single small fused consumer each.
    forward, predict_proba, predict_entropy = make_ensemble(w1, b1, w2, b2)

    out = jax.block_until_ready(forward(x))
    ref = ensemble_forward_ref(x, w1, b1, w2, b2)
    assert out.shape == (num_models, batch, num_classes)
    assert jnp.allclose(out, ref, atol=1e-4, rtol=1e-4), "forward mismatch vs reference"

    # predict_proba / predict_entropy semantics check.
    proba = jax.block_until_ready(predict_proba(x))
    ent = jax.block_until_ready(predict_entropy(x))
    proba_ref = jax.nn.softmax(ref, axis=2).mean(axis=0)
    p_ref = proba_ref.max(axis=1)
    ent_ref = -(jnp.nan_to_num(p_ref * jnp.log(p_ref))
                + jnp.nan_to_num((1.0 - p_ref) * jnp.log(1.0 - p_ref)))
    assert jnp.allclose(proba, proba_ref, atol=1e-5, rtol=1e-5), "proba mismatch"
    assert jnp.allclose(ent, ent_ref, atol=1e-5, rtol=1e-5), "entropy mismatch"

    print("KERNEL_OK")
</pallas_src>

<mosaic_0001>
module attributes {stable_mosaic.version = 11 : i64} {
  func.func @_ensemble_fused_kernel(%arg0: memref<8x32xf32, #tpu.memory_space<vmem>>, %arg1: memref<32x512xf32, #tpu.memory_space<vmem>>, %arg2: memref<512x128xf32, #tpu.memory_space<vmem>>, %arg3: memref<1x640xf32, #tpu.memory_space<vmem>>, %arg4: memref<8x128xf32, #tpu.memory_space<vmem>>) attributes {dimension_semantics = [], scalar_prefetch = 0 : i64, scratch_operands = 0 : i64, tpu.core_type = #tpu.core_type<tc>} {
    %c0 = arith.constant 0 : index
    %c0_0 = arith.constant 0 : index
    %0 = vector.load %arg3[%c0, %c0_0] : memref<1x640xf32, #tpu.memory_space<vmem>>, vector<1x512xf32>
    %c0_1 = arith.constant 0 : index
    %c512 = arith.constant 512 : index
    %1 = vector.load %arg3[%c0_1, %c512] : memref<1x640xf32, #tpu.memory_space<vmem>>, vector<1x128xf32>
    %c0_2 = arith.constant 0 : index
    %c0_3 = arith.constant 0 : index
    %2 = vector.load %arg0[%c0_2, %c0_3] : memref<8x32xf32, #tpu.memory_space<vmem>>, vector<8x32xf32>
    %c0_4 = arith.constant 0 : index
    %c0_5 = arith.constant 0 : index
    %3 = vector.load %arg1[%c0_4, %c0_5] : memref<32x512xf32, #tpu.memory_space<vmem>>, vector<32x512xf32>
    %cst = arith.constant dense<0.000000e+00> : vector<8x512xf32>
    %4 = tpu.matmul %2, %3, %cst {dimension_numbers = #tpu.dot_dimension_numbers<[1], [0], [0], [1], [0, 0, 1, 1], [], []>} : vector<8x32xf32>, vector<32x512xf32>, vector<8x512xf32> -> vector<8x512xf32>
    %5 = vector.broadcast %0 : vector<1x512xf32> to vector<8x512xf32>
    %6 = arith.addf %4, %5 : vector<8x512xf32>
    %cst_6 = arith.constant 0.000000e+00 : f32
    %7 = vector.broadcast %cst_6 : f32 to vector<8x512xf32>
    %8 = arith.maximumf %6, %7 : vector<8x512xf32>
    %c0_7 = arith.constant 0 : index
    %c0_8 = arith.constant 0 : index
    %9 = vector.load %arg2[%c0_7, %c0_8] : memref<512x128xf32, #tpu.memory_space<vmem>>, vector<512x128xf32>
    %cst_9 = arith.constant dense<0.000000e+00> : vector<8x128xf32>
    %10 = tpu.matmul %8, %9, %cst_9 {dimension_numbers = #tpu.dot_dimension_numbers<[1], [0], [0], [1], [0, 0, 1, 1], [], []>} : vector<8x512xf32>, vector<512x128xf32>, vector<8x128xf32> -> vector<8x128xf32>
    %11 = vector.broadcast %1 : vector<1x128xf32> to vector<8x128xf32>
    %12 = arith.addf %10, %11 : vector<8x128xf32>
    %c0_10 = arith.constant 0 : index
    %c0_11 = arith.constant 0 : index
    %13 = vector.load %arg4[%c0_10, %c0_11] : memref<8x128xf32, #tpu.memory_space<vmem>>, vector<8x128xf32>
    tpu.vector_store %arg4[%c0_10, %c0_11], %12 {strides = array<i32>} : memref<8x128xf32, #tpu.memory_space<vmem>>, vector<8x128xf32>,
    return
  }
}

</mosaic_0001>

<bundles_post_ra>
// kernel: forward.1
= control target key start
LH: loop header
LB: loop body
LE: loop exit
PB: predicated region body
PF: predicated region fallthrough
CT: control target
= control target key end

     0   :  { %9 = vsyncpa [#allocation3], 0  ;;  %s659_s0 = inlined_call_operand.hbm [shape: f32[8,32], index: 0, kind: input, shape index: {}]   ;;  %s660_s1 = inlined_call_operand.hbm [shape: f32[32,512], index: 1, kind: input, shape index: {}]   ;;  %s661_s2 = inlined_call_operand.hbm [shape: f32[512,128], index: 2, kind: input, shape index: {}]   ;;  %s662_s3 = inlined_call_operand.vmem [shape: f32[1,640], index: 3, kind: input, shape index: {}]   ;;  %s663_s4 = inlined_call_operand.vmem [shape: f32[8,128], index: 4, kind: output, shape index: {}]  }
   0x1   :  { %10 = vsyncpa [#allocation5], 0  ;;  %s608_s15 = smov [#allocation4]  }
   0x2   :  { %s26_s16 = sshll.u32 %s608_s15, 4  ;;  %s27_s16 = int_to_ptr.vmem [resolvable:$true] %s26_s16 }
   0x3   :  { %s552_s17 = scalar_lea.vmem %s27_s16, 2048  ;;  %p557_p1 = scmp.lt.s32.totalorder %s27_s16, %s27_s16 }
   0x4   :  { %p553_p0 = scmp.ne.s32.totalorder %s27_s16, %s552_s17  ;;  %p558_p2 = scmp.lt.s32.totalorder %s552_s17, %s552_s17 }
   0x6   :  { %p559_p3 = por %p558_p2, %p557_p1 }
   0x8   :  { %p560_p4 = pnand %p559_p3, %p553_p0 }
   0xa   :  { %563 = shalt.err (!%p560_p4)
}
   0xb   :  { %s609_s18 = smov 512   ;;  %s610_s19 = smov 32  }
   0xc   :  { %32 = dma.hbm_to_vmem [thread:$0]  %s660_s1, 2048, %s27_s16, [#allocation5], %s609_s18, %s609_s18, %s610_s19  }
   0xd   :  { %s611_s22 = smov [#allocation2]   ;;  %s612_s24 = smov [#allocation6]  }
   0xe   :  { %s17_s23 = sshll.u32 %s611_s22, 4  ;;  %s38_s25 = sshll.u32 %s612_s24, 4  ;;  %s18_s23 = int_to_ptr.vmem [resolvable:$true] %s17_s23  ;;  %s39_s25 = int_to_ptr.vmem [resolvable:$true] %s38_s25 }
   0xf   :  { %s572_s26 = scalar_lea.vmem %s18_s23, 128  ;;  %p577_p6 = scmp.lt.s32.totalorder %s18_s23, %s18_s23 }
  0x10   :  { %p573_p5 = scmp.ne.s32.totalorder %s18_s23, %s572_s26  ;;  %p578_p7 = scmp.lt.s32.totalorder %s572_s26, %s572_s26 }
  0x12   :  { %p579_p8 = por %p578_p7, %p577_p6 }
  0x14   :  { %p580_p9 = pnand %p579_p8, %p573_p5 }
  0x16   :  { %583 = shalt.err (!%p580_p9)
}
  0x17   :  { %20 = dma.hbm_to_vmem [thread:$0]  %s659_s0, 128, %s18_s23, [#allocation3]  }
  0x18   :  { %s592_s29 = scalar_lea.vmem %s39_s25, 8192  ;;  %p597_p11 = scmp.lt.s32.totalorder %s39_s25, %s39_s25 }
  0x19   :  { %p593_p10 = scmp.ne.s32.totalorder %s39_s25, %s592_s29  ;;  %p598_p12 = scmp.lt.s32.totalorder %s592_s29, %s592_s29 }
  0x1b   :  { %p599_p13 = por %p598_p12, %p597_p11 }
  0x1d   :  { %p600_p0 = pnand %p599_p13, %p593_p10 }
  0x1f   :  { %603 = shalt.err (!%p600_p0)
}
  0x20   :  { %s613_s1 = smov 128   ;;  %s614_s30 = smov 8  }
  0x21   :  { %44 = dma.hbm_to_vmem [thread:$0]  %s661_s2, 8192, %s39_s25, [#allocation5], %s613_s1, %s613_s1, %s614_s30  }
  0x22   :  { %604 = dma.done.wait [#allocation3], 128  }
  0x23   :  { %605 = vsyncadd [#allocation3], 4294967168 }
  0x24   :  { %606 = dma.done.wait [#allocation5], 10240  }
  0x25   :  { %607 = vsyncadd [#allocation5], 4294957056  ;;  %v615_v0 = vmov 0.0   ;;  %v72_v1 = vld [vmem:[#allocation4 + $0x68] sm:$0xff]  ;;  %v74_v2 = vld [vmem:[#allocation4 + $0x78] sm:$0xff]  ;;  %vm96_vm0 = vcmask 261120  }
  0x26   :  { %164 = vmatprep.mubr.f32.mxu0 %v615_v0  ;;  %235 = vmatprep.mubr.f32.mxu1 %v615_v0  ;;  %v71_v3 = vld [vmem:[#allocation4 + $0x60] sm:$0xff]  ;;  %v73_v4 = vld [vmem:[#allocation4 + $0x70] sm:$0xff]  ;;  %v68_v5 = vld [vmem:[#allocation4 + $0x48] sm:$0xff] }
  0x27   :  { %124 = vmatprep.subr.mxu0 %v72_v1  ;;  %195 = vmatprep.subr.mxu1 %v74_v2  ;;  %v70_v6 = vld [vmem:[#allocation4 + $0x58] sm:$0xff]  ;;  %v67_v7 = vld [vmem:[#allocation4 + $0x40] sm:$0xff]  ;;  %v69_v8 = vld [vmem:[#allocation4 + $0x50] sm:$0xff] }
  0x28   :  { %125 = vmatpush1.msra.mxu0 %v71_v3  ;;  %196 = vmatpush1.msra.mxu1 %v73_v4  ;;  %v64_v9 = vld [vmem:[#allocation4 + $0x28] sm:$0xff]  ;;  %v66_v10 = vld [vmem:[#allocation4 + $0x38] sm:$0xff]  ;;  %v63_v11 = vld [vmem:[#allocation4 + $0x20] sm:$0xff] }
  0x29   :  { %126 = vmatprep.subr.mxu0 %v68_v5  ;;  %197 = vmatprep.subr.mxu1 %v70_v6  ;;  %v65_v12 = vld [vmem:[#allocation4 + $0x30] sm:$0xff]  ;;  %v60_v13 = vld [vmem:[#allocation4 + $0x8] sm:$0xff]  ;;  %v62_v14 = vld [vmem:[#allocation4 + $0x18] sm:$0xff] }
  0x2a   :  { %127 = vmatpush1.msra.mxu0 %v67_v7  ;;  %198 = vmatpush1.msra.mxu1 %v69_v8  ;;  %v59_v15 = vld [vmem:[#allocation4] sm:$0xff]  ;;  %v61_v16 = vld [vmem:[#allocation4 + $0x10] sm:$0xff]  ;;  %v58_v17 = vld [vmem:[#allocation2] sm:$0xff] }
  0x2b   :  { %128 = vmatprep.subr.mxu0 %v64_v9  ;;  %199 = vmatprep.subr.mxu1 %v66_v10  ;;  %v277_v18 = vld [vmem:[#allocation6 + $0xf8] sm:$0xff]  ;;  %v276_v22 = vld [vmem:[#allocation6 + $0xf0] sm:$0xff]  ;;  %v275_v26 = vld [vmem:[#allocation6 + $0xe8] sm:$0xff] }
  0x2c   :  { %129 = vmatpush1.msra.mxu0 %v63_v11  ;;  %200 = vmatpush1.msra.mxu1 %v65_v12  ;;  %v309_v19 = vld [vmem:[#allocation6 + $0x1f8] sm:$0xff]  ;;  %v308_v23 = vld [vmem:[#allocation6 + $0x1f0] sm:$0xff]  ;;  %v307_v27 = vld [vmem:[#allocation6 + $0x1e8] sm:$0xff] }
  0x2d   :  { %130 = vmatprep.subr.mxu0 %v60_v13  ;;  %201 = vmatprep.subr.mxu1 %v62_v14  ;;  %v261_v20 = vld [vmem:[#allocation6 + $0x78] sm:$0xff]  ;;  %v260_v24 = vld [vmem:[#allocation6 + $0x70] sm:$0xff]  ;;  %v259_v28 = vld [vmem:[#allocation6 + $0x68] sm:$0xff] }
  0x2e   :  { %131 = vmatpush1.msra.mxu0 %v59_v15  ;;  %202 = vmatpush1.msra.mxu1 %v61_v16  ;;  %v293_v21 = vld [vmem:[#allocation6 + $0x178] sm:$0xff]  ;;  %v292_v25 = vld [vmem:[#allocation6 + $0x170] sm:$0xff]  ;;  %v291_v29 = vld [vmem:[#allocation6 + $0x168] sm:$0xff] }
  0x2f   :  { %463 = vmatmul.mubr.msk.f32.vlgmr.msra.gmra.mxu0 %vm96_vm0, %v58_v17  ;;  %464 = vmatmul.mubr.msk.f32.vlgmr.msra.gmra.mxu1 %vm96_vm0, %v58_v17  ;;  %v274_v30 = vld [vmem:[#allocation6 + $0xe0] sm:$0xff]  ;;  %v273_v34 = vld [vmem:[#allocation6 + $0xd8] sm:$0xff]  ;;  %v272_v38 = vld [vmem:[#allocation6 + $0xd0] sm:$0xff] }
  0x30   :  { %466 = vmatprep.subr.mxu0 %v277_v18  ;;  %501 = vmatprep.subr.mxu1 %v309_v19  ;;  %v306_v31 = vld [vmem:[#allocation6 + $0x1e0] sm:$0xff]  ;;  %v305_v35 = vld [vmem:[#allocation6 + $0x1d8] sm:$0xff]  ;;  %v304_v39 = vld [vmem:[#allocation6 + $0x1d0] sm:$0xff]  ;;  %v76_v18 = vlaneseq }
  0x31   :  { %467 = vmatpush3.msra.mxu0 %v261_v20  ;;  %502 = vmatpush3.msra.mxu1 %v293_v21  ;;  %v258_v32 = vld [vmem:[#allocation6 + $0x60] sm:$0xff]  ;;  %v257_v36 = vld [vmem:[#allocation6 + $0x58] sm:$0xff]  ;;  %v256_v40 = vld [vmem:[#allocation6 + $0x50] sm:$0xff] }
  0x32   :  { %468 = vmatprep.subr.mxu0 %v276_v22  ;;  %503 = vmatprep.subr.mxu1 %v308_v23  ;;  %v290_v33 = vld [vmem:[#allocation6 + $0x160] sm:$0xff]  ;;  %v289_v37 = vld [vmem:[#allocation6 + $0x158] sm:$0xff]  ;;  %v288_v41 = vld [vmem:[#allocation6 + $0x150] sm:$0xff]  ;;  %v77_v19 = vshrl.u32 %v76_v18, 7 }
  0x33   :  { %469 = vmatpush3.msra.mxu0 %v260_v24  ;;  %504 = vmatpush3.msra.mxu1 %v292_v25  ;;  %v271_v42 = vld [vmem:[#allocation6 + $0xc8] sm:$0xff]  ;;  %v270_v46 = vld [vmem:[#allocation6 + $0xc0] sm:$0xff]  ;;  %v269_v50 = vld [vmem:[#allocation6 + $0xb8] sm:$0xff] }
  0x34   :  { %470 = vmatprep.subr.mxu0 %v275_v26  ;;  %505 = vmatprep.subr.mxu1 %v307_v27  ;;  %v303_v43 = vld [vmem:[#allocation6 + $0x1c8] sm:$0xff]  ;;  %v302_v47 = vld [vmem:[#allocation6 + $0x1c0] sm:$0xff]  ;;  %v301_v51 = vld [vmem:[#allocation6 + $0x1b8] sm:$0xff]  ;;  %v86_v20 = vsub.s32 2, %v77_v19  ;;  %v78_v21 = vsub.s32 0, %v77_v19  ;;  %v82_v23 = vsub.s32 1, %v77_v19 }
  0x35   :  { %471 = vmatpush3.msra.mxu0 %v259_v28  ;;  %506 = vmatpush3.msra.mxu1 %v291_v29  ;;  %v255_v44 = vld [vmem:[#allocation6 + $0x48] sm:$0xff]  ;;  %v254_v48 = vld [vmem:[#allocation6 + $0x40] sm:$0xff]  ;;  %v253_v52 = vld [vmem:[#allocation6 + $0x38] sm:$0xff]  ;;  %v90_v24 = vsub.s32 3, %v77_v19 }
  0x36   :  { %472 = vmatprep.subr.mxu0 %v274_v30  ;;  %507 = vmatprep.subr.mxu1 %v306_v31  ;;  %v287_v45 = vld [vmem:[#allocation6 + $0x148] sm:$0xff]  ;;  %v286_v49 = vld [vmem:[#allocation6 + $0x140] sm:$0xff]  ;;  %v285_v53 = vld [vmem:[#allocation6 + $0x138] sm:$0xff] }
  0x37   :  { %473 = vmatpush3.msra.mxu0 %v258_v32  ;;  %508 = vmatpush3.msra.mxu1 %v290_v33  ;;  %v268_v54 = vld [vmem:[#allocation6 + $0xb0] sm:$0xff]  ;;  %v267_v58 = vld [vmem:[#allocation6 + $0xa8] sm:$0xff]  ;;  %v266_v62 = vld [vmem:[#allocation6 + $0xa0] sm:$0xff] }
  0x38   :  { %474 = vmatprep.subr.mxu0 %v273_v34  ;;  %509 = vmatprep.subr.mxu1 %v305_v35  ;;  %v300_v55 = vld [vmem:[#allocation6 + $0x1b0] sm:$0xff]  ;;  %v299_v59 = vld [vmem:[#allocation6 + $0x1a8] sm:$0xff]  ;;  %v298_v63 = vld [vmem:[#allocation6 + $0x1a0] sm:$0xff] }
  0x39   :  { %475 = vmatpush3.msra.mxu0 %v257_v36  ;;  %510 = vmatpush3.msra.mxu1 %v289_v37  ;;  %v252_v56 = vld [vmem:[#allocation6 + $0x30] sm:$0xff]  ;;  %v251_v60 = vld [vmem:[#allocation6 + $0x28] sm:$0xff]  ;;  %v250_v0 = vld [vmem:[#allocation6 + $0x20] sm:$0xff] }
  0x3a   :  { %476 = vmatprep.subr.mxu0 %v272_v38  ;;  %511 = vmatprep.subr.mxu1 %v304_v39  ;;  %v284_v57 = vld [vmem:[#allocation6 + $0x130] sm:$0xff]  ;;  %v283_v61 = vld [vmem:[#allocation6 + $0x128] sm:$0xff]  ;;  %v282_v1 = vld [vmem:[#allocation6 + $0x120] sm:$0xff] }
  0x3b   :  { %477 = vmatpush3.msra.mxu0 %v256_v40  ;;  %512 = vmatpush3.msra.mxu1 %v288_v41  ;;  %v265_v2 = vld [vmem:[#allocation6 + $0x98] sm:$0xff]  ;;  %v264_v6 = vld [vmem:[#allocation6 + $0x90] sm:$0xff]  ;;  %v263_v10 = vld [vmem:[#allocation6 + $0x88] sm:$0xff] }
  0x3c   :  { %478 = vmatprep.subr.mxu0 %v271_v42  ;;  %513 = vmatprep.subr.mxu1 %v303_v43  ;;  %v297_v3 = vld [vmem:[#allocation6 + $0x198] sm:$0xff]  ;;  %v296_v7 = vld [vmem:[#allocation6 + $0x190] sm:$0xff]  ;;  %v295_v11 = vld [vmem:[#allocation6 + $0x188] sm:$0xff] }
  0x3d   :  { %479 = vmatpush3.msra.mxu0 %v255_v44  ;;  %514 = vmatpush3.msra.mxu1 %v287_v45  ;;  %v249_v4 = vld [vmem:[#allocation6 + $0x18] sm:$0xff]  ;;  %v248_v8 = vld [vmem:[#allocation6 + $0x10] sm:$0xff]  ;;  %v247_v12 = vld [vmem:[#allocation6 + $0x8] sm:$0xff] }
  0x3e   :  { %480 = vmatprep.subr.mxu0 %v270_v46  ;;  %515 = vmatprep.subr.mxu1 %v302_v47  ;;  %v281_v5 = vld [vmem:[#allocation6 + $0x118] sm:$0xff]  ;;  %v280_v9 = vld [vmem:[#allocation6 + $0x110] sm:$0xff]  ;;  %v279_v13 = vld [vmem:[#allocation6 + $0x108] sm:$0xff] }
  0x3f   :  { %481 = vmatpush3.msra.mxu0 %v254_v48  ;;  %516 = vmatpush3.msra.mxu1 %v286_v49  ;;  %v262_v14 = vld [vmem:[#allocation6 + $0x80] sm:$0xff]  ;;  %v56_v22 = vld [vmem:[%s662_s3] sm:$0xf]  ;;  %v465_v43 = vld [vmem:[%s662_s3 + $0x4] ss:$0 sm:$0xff] }
  0x40   :  { %482 = vmatprep.subr.mxu0 %v269_v50  ;;  %517 = vmatprep.subr.mxu1 %v301_v51  ;;  %v294_v15 = vld [vmem:[#allocation6 + $0x180] sm:$0xff]  ;;  %v87_v25 = vrot.slane %v56_v22, %v86_v20  ;;  %v79_v26 = vrot.slane %v56_v22, %v78_v21  ;;  %v83_v27 = vrot.slane %v56_v22, %v82_v23 }
  0x41   :  { %483 = vmatpush3.msra.mxu0 %v253_v52  ;;  %518 = vmatpush3.msra.mxu1 %v285_v53  ;;  %v246_v16 = vld [vmem:[#allocation6] sm:$0xff]  ;;  %v91_v28 = vrot.slane %v56_v22, %v90_v24 }
  0x42   :  { %484 = vmatprep.subr.mxu0 %v268_v54  ;;  %519 = vmatprep.subr.mxu1 %v300_v55  ;;  %v278_v17 = vld [vmem:[#allocation6 + $0x100] sm:$0xff] }
  0x43   :  { %485 = vmatpush3.msra.mxu0 %v252_v56  ;;  %520 = vmatpush3.msra.mxu1 %v284_v57 }
  0x44   :  { %486 = vmatprep.subr.mxu0 %v267_v58  ;;  %521 = vmatprep.subr.mxu1 %v299_v59 }
  0x45   :  { %487 = vmatpush3.msra.mxu0 %v251_v60  ;;  %522 = vmatpush3.msra.mxu1 %v283_v61 }
  0x46   :  { %488 = vmatprep.subr.mxu0 %v266_v62  ;;  %523 = vmatprep.subr.mxu1 %v298_v63 }
  0x47   :  { %489 = vmatpush3.msra.mxu0 %v250_v0  ;;  %524 = vmatpush3.msra.mxu1 %v282_v1 }
  0x48   :  { %490 = vmatprep.subr.mxu0 %v265_v2  ;;  %525 = vmatprep.subr.mxu1 %v297_v3 }
  0x49   :  { %491 = vmatpush3.msra.mxu0 %v249_v4  ;;  %526 = vmatpush3.msra.mxu1 %v281_v5 }
  0x4a   :  { %492 = vmatprep.subr.mxu0 %v264_v6  ;;  %527 = vmatprep.subr.mxu1 %v296_v7 }
  0x4b   :  { %493 = vmatpush3.msra.mxu0 %v248_v8  ;;  %528 = vmatpush3.msra.mxu1 %v280_v9 }
  0x4c   :  { %494 = vmatprep.subr.mxu0 %v263_v10  ;;  %529 = vmatprep.subr.mxu1 %v295_v11 }
  0x4d   :  { %495 = vmatpush3.msra.mxu0 %v247_v12  ;;  %530 = vmatpush3.msra.mxu1 %v279_v13 }
  0x4e   :  { %496 = vmatprep.subr.mxu0 %v262_v14  ;;  %531 = vmatprep.subr.mxu1 %v294_v15 }
  0x4f   :  { %497 = vmatpush3.msra.mxu0 %v246_v16  ;;  %532 = vmatpush3.msra.mxu1 %v278_v17 }
  0xef   :  { %v166_v29 = vpop.f32.mrf.mxu0  ;;  %v237_v30 = vpop.f32.mrf.mxu1 }
  0xf0   :  { %v238_v31 = vadd.f32 %v237_v30, %v87_v25  ;;  %v167_v32 = vadd.f32 %v166_v29, %v79_v26 }
  0xf1   :  { %v168_v33 = vpop.f32.mrf.mxu0  ;;  %v239_v34 = vpop.f32.mrf.mxu1 }
  0xf2   :  { %v169_v35 = vadd.f32 %v168_v33, %v83_v27  ;;  %v240_v36 = vadd.f32 %v239_v34, %v91_v28  ;;  %v244_v37 = vmax.f32 %v238_v31, 0.0  ;;  %v242_v40 = vmax.f32 %v167_v32, 0.0 }
  0xf4   :  { %v243_v38 = vmax.f32 %v169_v35, 0.0  ;;  %v245_v39 = vmax.f32 %v240_v36, 0.0 }
  0xf6   :  { %380 = vmatprep.mubr.f32.mxu0 %v243_v38  ;;  %450 = vmatprep.mubr.f32.mxu1 %v245_v39 }
  0xf7   :  { %381 = vmatmul.mubr.f32.vlgmr.msra.gmra.mxu0 %v242_v40  ;;  %451 = vmatmul.mubr.f32.vlgmr.msra.gmra.mxu1 %v244_v37 }
 0x1b7   :  { %v498_v41 = vpop.f32.mrf.mxu0  ;;  %v533_v42 = vpop.f32.mrf.mxu1 }
 0x1b9   :  { %v499_v44 = vpop.f32.mrf.mxu0  ;;  %v534_v45 = vpop.f32.mrf.mxu1 }
 0x1ba   :  { %v500_v46 = vadd.f32 %v499_v44, %v498_v41  ;;  %v535_v48 = vadd.f32 %v534_v45, %v533_v42 }
 0x1bc   :  { %v383_v47 = vadd.f32 %v500_v46, %v465_v43 }
 0x1be   :  { %v453_v49 = vadd.f32 %v535_v48, %v383_v47 }
 0x1c0   :  { %456 = vst [vmem:[%s663_s4] sm:$0xff] %v453_v49 }
 0x1c1   :  { %461 = vsyncpa [#allocation3], 1 }
 0x1c2   :  { %462 = vsyncpa [#allocation5], 1 }

</bundles_post_ra>
